<compile_context>
chip_gen: v5e
topology: v5e:2x2
jax: 0.10.0
libtpu: 0.0.40
codegen_flags: <defaults>
</compile_context>

<pallas_src>
import jax
import jax.numpy as jnp
from jax.experimental import pallas as pl
from jax.experimental.pallas import tpu as pltpu


def _round_up(n, m):
    return ((n + m - 1) // m) * m


def dddqn_kernel(x_ref, w1_ref, b1_ref, w2_ref, b2_ref, w3_ref, b3_ref, o_ref):
    # fc1 + ReLU (bf16 MXU inputs, f32 accumulate; bias/ReLU in f32)
    x = x_ref[...].astype(jnp.bfloat16)
    h1 = jnp.dot(x, w1_ref[...], preferred_element_type=jnp.float32)
    h1 = jnp.maximum(h1 + b1_ref[...], 0.0).astype(jnp.bfloat16)
    # fc2 + ReLU
    h2 = jnp.dot(h1, w2_ref[...], preferred_element_type=jnp.float32)
    h2 = jnp.maximum(h2 + b2_ref[...], 0.0).astype(jnp.bfloat16)
    # fc3 (no activation)
    out = jnp.dot(h2, w3_ref[...], preferred_element_type=jnp.float32)
    o_ref[...] = (out + b3_ref[...]).astype(o_ref.dtype)


def prepare_dddqn_params(params):
    """One-time weight prep (hoisted out of the per-call path): bf16 weights, f32 bias rows."""
    bf16, f32 = jnp.bfloat16, jnp.float32
    return {
        "w1": params["w1"].astype(bf16),
        "w2": params["w2"].astype(bf16),
        "w3": params["w3"].astype(bf16),
        "b1": params["b1"].reshape(1, -1).astype(f32),
        "b2": params["b2"].reshape(1, -1).astype(f32),
        "b3": params["b3"].reshape(1, -1).astype(f32),
    }


def dddqn_forward(x, prepared, *, batch_tile=1024):
    """x: [B, input_dim] float32; prepared: output of prepare_dddqn_params.

    Returns [B, output_dim] float32 Q-values.
    """
    B, in_dim = x.shape
    w1, w2, w3 = prepared["w1"], prepared["w2"], prepared["w3"]
    b1, b2, b3 = prepared["b1"], prepared["b2"], prepared["b3"]
    h1d = w1.shape[1]          # 256
    h2d = w2.shape[1]          # 128
    out_dim = w3.shape[1]

    # --- batch tiling: aim for >=2 grid steps (v7x megacore), sublane-align to 16 -------
    tb = min(int(batch_tile), _round_up(max(-(-B // 2), 1), 16))
    tb = max(16, min(tb, _round_up(B, 16)))
    B_pad = _round_up(B, tb)
    grid = (B_pad // tb,)

    # Batch-only zero pad of x (rows, never columns); no-op when B divides tb.
    if B_pad != B:
        xp = jnp.zeros((B_pad, in_dim), x.dtype).at[:B, :].set(x)
    else:
        xp = x

    f32 = jnp.float32

    # --- VMEM budget: resident (double-buffered) weights + io tiles + intermediates -----
    weight_bytes = 2 * ((w1.size + w2.size + w3.size) * 2
                        + (b1.size + b2.size + b3.size) * 4)
    io_bytes = 2 * tb * (in_dim * 4 + out_dim * 4)          # double-buffered x / out tiles
    act_bytes = tb * (h1d + h2d) * (4 + 2)                  # f32 + bf16 in-flight intermediates
    vmem_limit = int(min(32 << 20, max(4 << 20, 2 * (weight_bytes + io_bytes + act_bytes))))

    # --- advisory cost estimate for XLA scheduling --------------------------------------
    flops = 2 * B_pad * (in_dim * h1d + h1d * h2d + h2d * out_dim)
    bytes_accessed = int(xp.size * 4
                         + (w1.size + w2.size + w3.size) * 2
                         + (b1.size + b2.size + b3.size) * 4
                         + B_pad * out_dim * 4)
    cost = pl.CostEstimate(flops=flops, transcendentals=0, bytes_accessed=bytes_accessed)

    out = pl.pallas_call(
        dddqn_kernel,
        out_shape=jax.ShapeDtypeStruct((B_pad, out_dim), f32),
        grid_spec=pltpu.PrefetchScalarGridSpec(
            num_scalar_prefetch=0,
            grid=grid,
            in_specs=[
                pl.BlockSpec((tb, in_dim), lambda i: (i, 0)),     # x tile (pipelined)
                pl.BlockSpec((in_dim, h1d), lambda i: (0, 0)),    # w1 (resident)
                pl.BlockSpec((1, h1d), lambda i: (0, 0)),         # b1 (resident)
                pl.BlockSpec((h1d, h2d), lambda i: (0, 0)),       # w2 (resident)
                pl.BlockSpec((1, h2d), lambda i: (0, 0)),         # b2 (resident)
                pl.BlockSpec((h2d, out_dim), lambda i: (0, 0)),   # w3 (resident)
                pl.BlockSpec((1, out_dim), lambda i: (0, 0)),     # b3 (resident)
            ],
            out_specs=pl.BlockSpec((tb, out_dim), lambda i: (i, 0)),
        ),
        compiler_params=pltpu.CompilerParams(
            dimension_semantics=("parallel",),
            vmem_limit_bytes=vmem_limit,
        ),
        cost_estimate=cost,
    )(xp, w1, b1, w2, b2, w3, b3)

    # Strip the batch-row padding (only when it was added).
    return out if B_pad == B else out[:B]


def init_dddqn_params(key, input_dim, output_dim):
    """Deterministic init mimicking PyTorch nn.Linear default: U(-1/sqrt(fan_in), +)."""
    dims = [(input_dim, 256), (256, 128), (128, output_dim)]
    params = {}
    for idx, (fan_in, fan_out) in enumerate(dims, start=1):
        key, kw, kb = jax.random.split(key, 3)
        bound = 1.0 / (fan_in ** 0.5)
        params[f"w{idx}"] = jax.random.uniform(
            kw, (fan_in, fan_out), jnp.float32, minval=-bound, maxval=bound)
        params[f"b{idx}"] = jax.random.uniform(
            kb, (fan_out,), jnp.float32, minval=-bound, maxval=bound)
    return params


def dddqn_reference_bf16(x, params):
    """Reference matching the kernel's numerics (bf16 matmul inputs, f32 accumulate)."""
    bf = jnp.bfloat16
    h = jnp.dot(x.astype(bf), params["w1"].astype(bf),
                preferred_element_type=jnp.float32) + params["b1"]
    h = jnp.maximum(h, 0.0)
    h = jnp.dot(h.astype(bf), params["w2"].astype(bf),
                preferred_element_type=jnp.float32) + params["b2"]
    h = jnp.maximum(h, 0.0)
    return jnp.dot(h.astype(bf), params["w3"].astype(bf),
                   preferred_element_type=jnp.float32) + params["b3"]


def dddqn_reference_f32(x, params):
    h = jnp.maximum(x @ params["w1"] + params["b1"], 0.0)
    h = jnp.maximum(h @ params["w2"] + params["b2"], 0.0)
    return h @ params["w3"] + params["b3"]


if __name__ == "__main__":
    input_dim = 32
    output_dim = 4

    key = jax.random.PRNGKey(0)
    key, kx = jax.random.split(key)
    params = init_dddqn_params(key, input_dim, output_dim)
    prepared = prepare_dddqn_params(params)          # one-time weight prep

    # Case 1: tiny inference (acting) batch -- single grid step, row-padded last tile.
    batch = 8
    x = jax.random.normal(kx, (batch, input_dim), jnp.float32)
    out = jax.block_until_ready(dddqn_forward(x, prepared))
    assert out.shape == (batch, output_dim)
    ref_bf = dddqn_reference_bf16(x, params)
    ref_f32 = dddqn_reference_f32(x, params)
    assert jnp.allclose(out, ref_bf, atol=2e-3, rtol=2e-3), "mismatch vs bf16 reference"
    assert jnp.allclose(out, ref_f32, atol=5e-2, rtol=5e-2), "mismatch vs f32 reference"

    # Case 2: training-size batch -- exercises the >=2-step (megacore) grid path, no padding.
    key, kx2 = jax.random.split(key)
    batch2 = 256
    x2 = jax.random.normal(kx2, (batch2, input_dim), jnp.float32)
    out2 = jax.block_until_ready(dddqn_forward(x2, prepared))
    assert out2.shape == (batch2, output_dim)
    ref2 = dddqn_reference_bf16(x2, params)
    assert jnp.allclose(out2, ref2, atol=2e-3, rtol=2e-3), "mismatch vs bf16 reference (tiled)"

    # Case 3: explicit small tile (multi-step pipeline with a non-trivial grid).
    out3 = jax.block_until_ready(dddqn_forward(x2, prepared, batch_tile=64))
    assert jnp.allclose(out3, ref2, atol=2e-3, rtol=2e-3), "mismatch vs bf16 reference (tb=64)"

    print("KERNEL_OK")
</pallas_src>

<mosaic_0001>
module attributes {stable_mosaic.version = 11 : i64} {
  func.func @dddqn_kernel(%arg0: i32, %arg1: memref<16x32xf32, #tpu.memory_space<vmem>>, %arg2: memref<32x256xbf16, #tpu.memory_space<vmem>>, %arg3: memref<1x256xf32, #tpu.memory_space<vmem>>, %arg4: memref<256x128xbf16, #tpu.memory_space<vmem>>, %arg5: memref<1x128xf32, #tpu.memory_space<vmem>>, %arg6: memref<128x4xbf16, #tpu.memory_space<vmem>>, %arg7: memref<1x4xf32, #tpu.memory_space<vmem>>, %arg8: memref<16x4xf32, #tpu.memory_space<vmem>>) attributes {dimension_semantics = [#tpu.dimension_semantics<parallel>], iteration_bounds = array<i64: 1>, scalar_prefetch = 0 : i64, scratch_operands = 0 : i64, tpu.core_type = #tpu.core_type<tc>, window_params = [{transform_indices = @transform_0, window_bounds = array<i64: 16, 32>}, {pipeline_mode = #tpu.pipeline_mode<synchronous>, transform_indices = @transform_1, window_bounds = array<i64: 32, 256>}, {pipeline_mode = #tpu.pipeline_mode<synchronous>, transform_indices = @transform_2, window_bounds = array<i64: 1, 256>}, {pipeline_mode = #tpu.pipeline_mode<synchronous>, transform_indices = @transform_3, window_bounds = array<i64: 256, 128>}, {pipeline_mode = #tpu.pipeline_mode<synchronous>, transform_indices = @transform_4, window_bounds = array<i64: 1, 128>}, {pipeline_mode = #tpu.pipeline_mode<synchronous>, transform_indices = @transform_5, window_bounds = array<i64: 128, 4>}, {pipeline_mode = #tpu.pipeline_mode<synchronous>, transform_indices = @transform_6, window_bounds = array<i64: 1, 4>}, {transform_indices = @transform_7, window_bounds = array<i64: 16, 4>}]} {
    %c0 = arith.constant 0 : index
    %c0_0 = arith.constant 0 : index
    %0 = vector.load %arg1[%c0, %c0_0] : memref<16x32xf32, #tpu.memory_space<vmem>>, vector<16x32xf32>
    %1 = arith.truncf %0 : vector<16x32xf32> to vector<16x32xbf16>
    %c0_1 = arith.constant 0 : index
    %c0_2 = arith.constant 0 : index
    %2 = vector.load %arg2[%c0_1, %c0_2] : memref<32x256xbf16, #tpu.memory_space<vmem>>, vector<32x256xbf16>
    %cst = arith.constant dense<0.000000e+00> : vector<16x256xf32>
    %3 = tpu.matmul %1, %2, %cst {dimension_numbers = #tpu.dot_dimension_numbers<[1], [0], [0], [1], [0, 0, 1, 1], [], []>} : vector<16x32xbf16>, vector<32x256xbf16>, vector<16x256xf32> -> vector<16x256xf32>
    %c0_3 = arith.constant 0 : index
    %c0_4 = arith.constant 0 : index
    %4 = vector.load %arg3[%c0_3, %c0_4] : memref<1x256xf32, #tpu.memory_space<vmem>>, vector<1x256xf32>
    %5 = vector.broadcast %4 : vector<1x256xf32> to vector<16x256xf32>
    %6 = arith.addf %3, %5 : vector<16x256xf32>
    %cst_5 = arith.constant 0.000000e+00 : f32
    %7 = vector.broadcast %cst_5 : f32 to vector<16x256xf32>
    %8 = arith.maximumf %6, %7 : vector<16x256xf32>
    %9 = arith.truncf %8 : vector<16x256xf32> to vector<16x256xbf16>
    %c0_6 = arith.constant 0 : index
    %c0_7 = arith.constant 0 : index
    %10 = vector.load %arg4[%c0_6, %c0_7] : memref<256x128xbf16, #tpu.memory_space<vmem>>, vector<256x128xbf16>
    %cst_8 = arith.constant dense<0.000000e+00> : vector<16x128xf32>
    %11 = tpu.matmul %9, %10, %cst_8 {dimension_numbers = #tpu.dot_dimension_numbers<[1], [0], [0], [1], [0, 0, 1, 1], [], []>} : vector<16x256xbf16>, vector<256x128xbf16>, vector<16x128xf32> -> vector<16x128xf32>
    %c0_9 = arith.constant 0 : index
    %c0_10 = arith.constant 0 : index
    %12 = vector.load %arg5[%c0_9, %c0_10] : memref<1x128xf32, #tpu.memory_space<vmem>>, vector<1x128xf32>
    %13 = vector.broadcast %12 : vector<1x128xf32> to vector<16x128xf32>
    %14 = arith.addf %11, %13 : vector<16x128xf32>
    %cst_11 = arith.constant 0.000000e+00 : f32
    %15 = vector.broadcast %cst_11 : f32 to vector<16x128xf32>
    %16 = arith.maximumf %14, %15 : vector<16x128xf32>
    %17 = arith.truncf %16 : vector<16x128xf32> to vector<16x128xbf16>
    %c0_12 = arith.constant 0 : index
    %c0_13 = arith.constant 0 : index
    %18 = vector.load %arg6[%c0_12, %c0_13] : memref<128x4xbf16, #tpu.memory_space<vmem>>, vector<128x4xbf16>
    %cst_14 = arith.constant dense<0.000000e+00> : vector<16x4xf32>
    %19 = tpu.matmul %17, %18, %cst_14 {dimension_numbers = #tpu.dot_dimension_numbers<[1], [0], [0], [1], [0, 0, 1, 1], [], []>} : vector<16x128xbf16>, vector<128x4xbf16>, vector<16x4xf32> -> vector<16x4xf32>
    %c0_15 = arith.constant 0 : index
    %c0_16 = arith.constant 0 : index
    %20 = vector.load %arg7[%c0_15, %c0_16] : memref<1x4xf32, #tpu.memory_space<vmem>>, vector<1x4xf32>
    %21 = vector.broadcast %20 : vector<1x4xf32> to vector<16x4xf32>
    %22 = arith.addf %19, %21 : vector<16x4xf32>
    %c0_17 = arith.constant 0 : index
    %c0_18 = arith.constant 0 : index
    %23 = vector.load %arg8[%c0_17, %c0_18] : memref<16x4xf32, #tpu.memory_space<vmem>>, vector<16x4xf32>
    tpu.vector_store %arg8[%c0_17, %c0_18], %22 {strides = array<i32>} : memref<16x4xf32, #tpu.memory_space<vmem>>, vector<16x4xf32>,
    return
  }
  func.func @transform_0(%arg0: i32) -> (i32, i32) {
    %c0_i32 = arith.constant 0 : i32
    %c0_i32_0 = arith.constant 0 : i32
    return %arg0, %c0_i32 : i32, i32
  }
  func.func @transform_1(%arg0: i32) -> (i32, i32) {
    %c0_i32 = arith.constant 0 : i32
    %c0_i32_0 = arith.constant 0 : i32
    %c0_i32_1 = arith.constant 0 : i32
    return %c0_i32, %c0_i32_0 : i32, i32
  }
  func.func @transform_2(%arg0: i32) -> (i32, i32) {
    %c0_i32 = arith.constant 0 : i32
    %c0_i32_0 = arith.constant 0 : i32
    %c0_i32_1 = arith.constant 0 : i32
    return %c0_i32, %c0_i32_0 : i32, i32
  }
  func.func @transform_3(%arg0: i32) -> (i32, i32) {
    %c0_i32 = arith.constant 0 : i32
    %c0_i32_0 = arith.constant 0 : i32
    %c0_i32_1 = arith.constant 0 : i32
    return %c0_i32, %c0_i32_0 : i32, i32
  }
  func.func @transform_4(%arg0: i32) -> (i32, i32) {
    %c0_i32 = arith.constant 0 : i32
    %c0_i32_0 = arith.constant 0 : i32
    %c0_i32_1 = arith.constant 0 : i32
    return %c0_i32, %c0_i32_0 : i32, i32
  }
  func.func @transform_5(%arg0: i32) -> (i32, i32) {
    %c0_i32 = arith.constant 0 : i32
    %c0_i32_0 = arith.constant 0 : i32
    %c0_i32_1 = arith.constant 0 : i32
    return %c0_i32, %c0_i32_0 : i32, i32
  }
  func.func @transform_6(%arg0: i32) -> (i32, i32) {
    %c0_i32 = arith.constant 0 : i32
    %c0_i32_0 = arith.constant 0 : i32
    %c0_i32_1 = arith.constant 0 : i32
    return %c0_i32, %c0_i32_0 : i32, i32
  }
  func.func @transform_7(%arg0: i32) -> (i32, i32) {
    %c0_i32 = arith.constant 0 : i32
    %c0_i32_0 = arith.constant 0 : i32
    return %arg0, %c0_i32 : i32, i32
  }
}

</mosaic_0001>

<bundles_post_ra>
// kernel: tpu_custom_call.1
= control target key start
LH: loop header
LB: loop body
LE: loop exit
PB: predicated region body
PF: predicated region fallthrough
CT: control target
= control target key end

     0   :  { %12 = vsyncpa [#allocation3], 0  ;;  %s540_s27 = smov [#allocation2]   ;;  %s541_s29 = smov 64   ;;  %s655_s0 = inlined_call_operand.vmem [shape: f32[16,32], index: 0, kind: input, shape index: {}]   ;;  %s656_s1 = inlined_call_operand.vmem [shape: bf16[32,256], index: 1, kind: input, shape index: {}]   ;;  %s657_s2 = inlined_call_operand.vmem [shape: f32[1,256], index: 2, kind: input, shape index: {}]   ;;  %s658_s3 = inlined_call_operand.hbm [shape: bf16[256,128], index: 3, kind: input, shape index: {}]   ;;  %s659_s4 = inlined_call_operand.vmem [shape: f32[1,128], index: 4, kind: input, shape index: {}]   ;;  %s660_s5 = inlined_call_operand.vmem [shape: bf16[128,4], index: 5, kind: input, shape index: {}]   ;;  %s661_s6 = inlined_call_operand.vmem [shape: f32[1,4], index: 6, kind: input, shape index: {}]   ;;  %s662_s7 = inlined_call_operand.vmem [shape: f32[16,4], index: 7, kind: output, shape index: {}]  }
   0x1   :  { %s23_s26 = sshll.u32 %s658_s3, 4  ;;  %s25_s28 = sshll.u32 %s540_s27, 4  ;;  %s24_s26 = int_to_ptr.hbm [resolvable:$true] %s23_s26  ;;  %s26_s28 = int_to_ptr.vmem [resolvable:$true] %s25_s28 }
   0x2   :  { %s542_s30 = smov 4  }
   0x3   :  { %31 = dma.hbm_to_vmem [thread:$0]  %s24_s26, 2048, %s26_s28, [#allocation3], %s541_s29, %s541_s29, %s542_s30  }
   0x4   :  { %538 = dma.done.wait [#allocation3], 2048  }
   0x5   :  { %539 = vsyncadd [#allocation3], 4294965248  ;;  %v377_v0 = vld [vmem:[%s656_s1 + $0x10] sm:$0xf]  ;;  %v484_v1 = vld [vmem:[%s656_s1 + $0x14] sm:$0xf0] }
   0x6   :  { %v369_v2 = vld [vmem:[%s656_s1] sm:$0xf]  ;;  %v378_v3 = vor.u32 %v484_v1, %v377_v0  ;;  %v482_v4 = vld [vmem:[%s656_s1 + $0x4] sm:$0xf0]  ;;  %v483_v5 = vld [vmem:[%s656_s1 + $0x14] sm:$0xf] }
   0x7   :  { %v379_v6 = vld [vmem:[%s656_s1 + $0x18] sm:$0xf0]  ;;  %v370_v7 = vor.u32 %v482_v4, %v369_v2  ;;  %v43_v8 = vld [vmem:[%s655_s0] sm:$0xff]  ;;  %v44_v9 = vld [vmem:[%s655_s0 + $0x8] sm:$0xff]  ;;  %vm76_vm0 = vcmask 261120   ;;  %vm359_vm1 = vcmask 31744  }
   0x8   :  { %86 = vmatpush.bf16.msra.mxu1 %v378_v3  ;;  %v492_v10 = vld [vmem:[#allocation2 + $0x38] sm:$0xff]  ;;  %v382_v11 = vor.u32 %v483_v5, %v379_v6  ;;  %v481_v12 = vld [vmem:[%s656_s1 + $0x4] sm:$0xf]  ;;  %v371_v13 = vld [vmem:[%s656_s1 + $0x8] sm:$0xf0]  ;;  %v45_v15 = vpack.c.bf16 %v44_v9, %v43_v8 }
   0x9   :  { %246 = vmatpush.bf16.msra.mxu2 %v492_v10  ;;  %v491_v14 = vld [vmem:[#allocation2 + $0x30] sm:$0xff]  ;;  %v374_v16 = vor.u32 %v481_v12, %v371_v13  ;;  %v490_v17 = vld [vmem:[#allocation2 + $0x28] sm:$0xff]  ;;  %v489_v18 = vld [vmem:[#allocation2 + $0x20] sm:$0xff] }
   0xa   :  { %v488_v19 = vld [vmem:[#allocation2 + $0x18] sm:$0xff]  ;;  %v487_v21 = vld [vmem:[#allocation2 + $0x10] sm:$0xff]  ;;  %v486_v23 = vld [vmem:[#allocation2 + $0x8] sm:$0xff] }
   0xb   :  { %v500_v20 = vld [vmem:[#allocation2 + $0x78] sm:$0xff]  ;;  %v499_v22 = vld [vmem:[#allocation2 + $0x70] sm:$0xff]  ;;  %v498_v24 = vld [vmem:[#allocation2 + $0x68] sm:$0xff] }
   0xc   :  { %87 = vmatpush.bf16.msra.mxu1 %v370_v7  ;;  %260 = vmatpush.bf16.msra.mxu3 %v500_v20  ;;  %v485_v25 = vld [vmem:[#allocation2] sm:$0xff]  ;;  %v496_v27 = vld [vmem:[#allocation2 + $0x58] sm:$0xff]  ;;  %v495_v28 = vld [vmem:[#allocation2 + $0x50] sm:$0xff] }
   0xd   :  { %247 = vmatpush.bf16.msra.mxu2 %v491_v14  ;;  %v497_v26 = vld [vmem:[#allocation2 + $0x60] sm:$0xff]  ;;  %v494_v29 = vld [vmem:[#allocation2 + $0x48] sm:$0xff]  ;;  %v508_v48 = vld [vmem:[%s660_s5 + $0x38] sm:$0xff] }
   0xe   :  { %v493_v30 = vld [vmem:[#allocation2 + $0x40] sm:$0xff]  ;;  %345 = vmatpush.bf16.msra.mxu0 %v508_v48  ;;  %v507_v49 = vld [vmem:[%s660_s5 + $0x30] sm:$0xff]  ;;  %v506_v50 = vld [vmem:[%s660_s5 + $0x28] sm:$0xff] }
   0xf   :  { %383 = vmatmul.msk.bf16.vlgmr.msra.gmra.mxu1 %vm76_vm0, %v45_v15  ;;  %v50_v31 = vld [vmem:[%s657_s2] sm:$0x3]  ;;  %v504_v52 = vld [vmem:[%s660_s5 + $0x18] sm:$0xff]  ;;  %v503_v53 = vld [vmem:[%s660_s5 + $0x10] sm:$0xff] }
  0x10   :  { %100 = vmatpush.bf16.msrb.mxu1 %v382_v11  ;;  %261 = vmatpush.bf16.msra.mxu3 %v499_v22  ;;  %v52_v33 = vperm.slane %v50_v31, 0  ;;  %v53_v41 = vperm.slane %v50_v31, 1  ;;  %v505_v51 = vld [vmem:[%s660_s5 + $0x20] sm:$0xff]  ;;  %v502_v54 = vld [vmem:[%s660_s5 + $0x8] sm:$0xff] }
  0x11   :  { %248 = vmatpush.bf16.msra.mxu2 %v490_v17  ;;  %v501_v55 = vld [vmem:[%s660_s5] sm:$0xff] }
  0x12   :  { %346 = vmatpush.bf16.msra.mxu0 %v507_v49  ;;  %v512_v58 = vld [vmem:[%s659_s4] ss:$0 sm:$0xff] }
  0x13   :  { %v513_v4 = vld [vmem:[%s661_s6] ss:$0 sm:$0xff] }
  0x14   :  { %101 = vmatpush.bf16.msrb.mxu1 %v374_v16  ;;  %262 = vmatpush.bf16.msra.mxu3 %v498_v24 }
  0x15   :  { %249 = vmatpush.bf16.msra.mxu2 %v489_v18 }
  0x16   :  { %347 = vmatpush.bf16.msra.mxu0 %v506_v50 }
  0x18   :  { %263 = vmatpush.bf16.msra.mxu3 %v497_v26 }
  0x19   :  { %250 = vmatpush.bf16.msra.mxu2 %v488_v19 }
  0x1a   :  { %348 = vmatpush.bf16.msra.mxu0 %v505_v51 }
  0x1c   :  { %264 = vmatpush.bf16.msra.mxu3 %v496_v27 }
  0x1d   :  { %251 = vmatpush.bf16.msra.mxu2 %v487_v21 }
  0x1e   :  { %349 = vmatpush.bf16.msra.mxu0 %v504_v52 }
  0x1f   :  { %384 = vmatmul.msk.bf16.vlgmr.msrb.gmra.mxu1 %vm76_vm0, %v45_v15 }
  0x20   :  { %265 = vmatpush.bf16.msra.mxu3 %v495_v28 }
  0x21   :  { %252 = vmatpush.bf16.msra.mxu2 %v486_v23 }
  0x22   :  { %350 = vmatpush.bf16.msra.mxu0 %v503_v53 }
  0x24   :  { %266 = vmatpush.bf16.msra.mxu3 %v494_v29 }
  0x25   :  { %253 = vmatpush.bf16.msra.mxu2 %v485_v25 }
  0x26   :  { %351 = vmatpush.bf16.msra.mxu0 %v502_v54 }
  0x28   :  { %267 = vmatpush.bf16.msra.mxu3 %v493_v30 }
  0x2a   :  { %352 = vmatpush.bf16.msra.mxu0 %v501_v55 }
  0x8c   :  { %v89_v32 = vpop.f32.mrf.mxu1 }
  0x8d   :  { %v90_v34 = vadd.f32 %v89_v32, %v52_v33 }
  0x8f   :  { %v108_v37 = vmax.f32 %v90_v34, 0.0 }
  0x94   :  { %v91_v35 = vpop.f32.mrf.mxu1 }
  0x95   :  { %v92_v36 = vadd.f32 %v91_v35, %v52_v33 }
  0x97   :  { %v110_v38 = vmax.f32 %v92_v36, 0.0 }
  0x99   :  { %v112_v39 = vpack.c.bf16 %v110_v38, %v108_v37 }
  0x9b   :  { %254 = vmatmul.bf16.vlgmr.msra.gmra.mxu2 %v112_v39 }
  0x9c   :  { %v103_v40 = vpop.f32.mrf.mxu1 }
  0x9d   :  { %v104_v42 = vadd.f32 %v103_v40, %v53_v41 }
  0x9f   :  { %v109_v45 = vmax.f32 %v104_v42, 0.0 }
  0xa4   :  { %v105_v43 = vpop.f32.mrf.mxu1 }
  0xa5   :  { %v106_v44 = vadd.f32 %v105_v43, %v53_v41 }
  0xa7   :  { %v111_v46 = vmax.f32 %v106_v44, 0.0 }
  0xa9   :  { %v113_v47 = vpack.c.bf16 %v111_v46, %v109_v45 }
  0xab   :  { %268 = vmatmul.bf16.vlgmr.msra.gmra.mxu3 %v113_v47 }
 0x11e   :  { %v255_v56 = vpop.f32.mrf.mxu2 }
 0x11f   :  { %v256_v60 = vadd.f32 %v512_v58, %v255_v56 }
 0x126   :  { %v257_v59 = vpop.f32.mrf.mxu2 }
 0x127   :  { %v258_v61 = vadd.f32 %v512_v58, %v257_v59 }
 0x12e   :  { %v269_v57 = vpop.f32.mrf.mxu3 }
 0x12f   :  { %v270_v62 = vadd.f32 %v269_v57, %v256_v60 }
 0x131   :  { %v274_v1 = vmax.f32 %v270_v62, 0.0 }
 0x136   :  { %v271_v63 = vpop.f32.mrf.mxu3 }
 0x137   :  { %v272_v0 = vadd.f32 %v271_v63, %v258_v61 }
 0x139   :  { %v275_v2 = vmax.f32 %v272_v0, 0.0 }
 0x13b   :  { %v276_v3 = vpack.c.bf16 %v275_v2, %v274_v1 }
 0x13d   :  { %353 = vmatmul.bf16.vlgmr.msra.gmra.mxu0 %v276_v3 }
 0x1ba   :  { %v354_v5 = vpop.f32.mrf.mxu0 }
 0x1bb   :  { %v355_v6 = vadd.f32 %v513_v4, %v354_v5 }
 0x1bd   :  { %360 = vst.msk [vmem:[%s662_s7] sm:$0xff] %vm359_vm1, %v355_v6 }
 0x1c2   :  { %v356_v7 = vpop.f32.mrf.mxu0 }
 0x1c3   :  { %v357_v8 = vadd.f32 %v513_v4, %v356_v7 }
 0x1c5   :  { %361 = vst.msk [vmem:[%s662_s7 + $0x8] sm:$0xff] %vm359_vm1, %v357_v8 }
 0x1c6   :  { %366 = vsyncpa [#allocation3], 1 }

</bundles_post_ra>
